<compile_context>
chip_gen: v7x
topology: tpu7x:2x2x1
jax: 0.10.0
libtpu: 0.0.40
codegen_flags: <defaults>
</compile_context>

<pallas_src>
import functools

import jax
import jax.numpy as jnp
from jax.experimental import pallas as pl
from jax.experimental.pallas import tpu as pltpu

CHARBONNIER_EPS = 1.0e-3  # nunif CharbonnierLoss default


def _lbp_loss_kernel(x_ref, t_ref, w_ref, o_ref, *, ksize):
    # x_ref, t_ref: (1, H, W, L)   f32, L = P*C (narrow channel-last layout)
    # w_ref:        (K*K*L, N)     f32 block-diagonal weights, N = P*OC
    # o_ref:        (1, 1, N)      f32 per-image partial Charbonnier sums
    _, H, W, L = x_ref.shape
    _kkl, N = w_ref.shape
    Ho = H - ksize + 1
    Wo = W - ksize + 1
    eps2 = jnp.float32(CHARBONNIER_EPS * CHARBONNIER_EPS)

    # Block-diagonal weights: load once, reused by every row's matmul.
    wm = w_ref[...]                                           # (K*K*L, N)

    def row_body(r, col_sum):
        # K-row window of the diff; conv(x) - conv(t) == conv(x - t).
        d = (x_ref[0, pl.ds(r, ksize), :, :]
             - t_ref[0, pl.ds(r, ksize), :, :])               # (K, W, L)
        # im2col for one output row: lane order tap*L + lane_in matches the
        # row order of wm (built in the wrapper).  All 2-D, no reshape.
        taps = [d[ki, kj:kj + Wo, :]
                for ki in range(ksize) for kj in range(ksize)]
        im2col = jnp.concatenate(taps, axis=-1)               # (Wo, K*K*L)
        # Grouped conv fan-out (L -> N) + 9-tap accumulation on the MXU.
        acc = jnp.dot(im2col, wm,
                      preferred_element_type=jnp.float32)     # (Wo, N)
        # Charbonnier term + partial reduction (single elementwise pass).
        v = jnp.sqrt(acc * acc + eps2)
        return col_sum + jnp.sum(v, axis=0, keepdims=True)    # (1, N)

    col_sum = jax.lax.fori_loop(0, Ho, row_body,
                                jnp.zeros((1, N), jnp.float32))
    o_ref[...] = col_sum[None]                                # (1, 1, N)


def _round_up(n, m):
    return -(-n // m) * m


def lbp_loss(x, t, weight, ksize=3):
    """x, t: (B, C, H, W) float32 (NCHW, like PyTorch). weight: (OC, 1, K, K)."""
    B, C, H, W = x.shape
    OC = weight.shape[0]
    assert OC % C == 0 and H >= ksize and W >= ksize
    m = OC // C
    KK = ksize * ksize
    Ho, Wo = H - ksize + 1, W - ksize + 1

    # Pack pairs of batch images along the channel/lane axis only when it does
    # not reduce the grid below 2 points (keep both v7x TensorCores busy for
    # small batches).  Exact: per-channel elementwise ops + global sum.
    P = 2 if (B % 2 == 0 and B >= 4 and (OC % 128) != 0) else 1
    Bp = B // P
    L = P * C                   # input lanes per packed image pair
    N = P * OC                  # output lanes
    KKL = KK * L                # matmul contraction dim

    def pack(a):
        a = jnp.transpose(a, (0, 2, 3, 1)).astype(jnp.float32)  # (B, H, W, C)
        a = a.reshape(Bp, P, H, W, C)
        a = jnp.transpose(a, (0, 2, 3, 1, 4))                   # (Bp, H, W, P, C)
        return a.reshape(Bp, H, W, L)                           # lane = j*C + c

    x_p = pack(x)
    t_p = pack(t)

    # Block-diagonal weight matrix Wm (K*K*L, P*OC).
    # Grouped conv (groups=C): out channel o = c*m + r reads input channel c.
    # Row index    = tap*L + j*C + c   (matches the in-kernel im2col lane order)
    # Column index = j*OC + c*m + r    (output lane order)
    # Values are +/-1, 0, 0.5*k^2 -> kept in f32; accumulation is f32 on MXU.
    w_flat = weight[:, 0].astype(jnp.float32).reshape(C, m, KK)  # [c, r, tap]
    w_t = jnp.transpose(w_flat, (2, 0, 1))                       # (KK, C, m)
    eye_p = jnp.eye(P, dtype=jnp.float32)
    eye_c = jnp.eye(C, dtype=jnp.float32)
    w_m = jnp.einsum("tcr,jk,cd->tjckdr", w_t, eye_p, eye_c)     # (KK,P,C,P,C,m)
    w_m = w_m.reshape(KKL, N)

    # VMEM budget: x/t blocks + the 128-lane-padded in-kernel temporaries
    # (d window, im2col, matmul result, Charbonnier).  Clamp well below v7x's
    # 64 MiB physical VMEM.
    lane = 128
    blk_bytes = H * _round_up(W, 8) * lane * 4                   # padded x/t block
    w_bytes = _round_up(KKL, 8) * lane * 4
    tmp_bytes = 4 * lane * (ksize * _round_up(W, 8)              # d window
                            + 3 * _round_up(Wo, 8)               # im2col/acc/v
                            + 16)
    need = 2 * 2 * blk_bytes + 2 * w_bytes + 4 * tmp_bytes + (2 << 20)
    vmem_limit = int(min(max(need, 32 << 20), 48 << 20))

    out = pl.pallas_call(
        functools.partial(_lbp_loss_kernel, ksize=ksize),
        grid=(Bp,),
        in_specs=[
            pl.BlockSpec((1, H, W, L), lambda b: (b, 0, 0, 0)),
            pl.BlockSpec((1, H, W, L), lambda b: (b, 0, 0, 0)),
            pl.BlockSpec((KKL, N), lambda b: (0, 0)),
        ],
        out_specs=pl.BlockSpec((1, 1, N), lambda b: (b, 0, 0)),
        out_shape=jax.ShapeDtypeStruct((Bp, 1, N), jnp.float32),
        compiler_params=pltpu.CompilerParams(
            dimension_semantics=("parallel",),
            vmem_limit_bytes=vmem_limit,
        ),
    )(x_p, t_p, w_m)

    denom = float(B * OC * Ho * Wo)
    return jnp.sum(out) / jnp.float32(denom)


def make_lbp_weight(key, in_channels, out_channels, ksize, sparcity=0.9):
    """generate_lbcnn_filters + LBPLoss.__init__ weight overrides (deterministic)."""
    k1, k2 = jax.random.split(key)
    shape = (out_channels, 1, ksize, ksize)  # groups=in_channels -> 1 input ch/filter
    filt = jax.random.bernoulli(k1, 0.5, shape).astype(jnp.float32) * 2.0 - 1.0
    drop = jax.random.uniform(k2, shape) > sparcity
    filt = jnp.where(drop, 0.0, filt)
    filt = filt.at[0].set(0.0)
    filt = filt.at[0, :, ksize // 2, ksize // 2].set(0.5 * ksize ** 2)
    return filt


def lbp_loss_ref(x, t, weight, ksize=3):
    """Pure-JAX reference (grouped conv + Charbonnier mean)."""
    B, C, H, W = x.shape

    def conv(a):
        return jax.lax.conv_general_dilated(
            a, weight, window_strides=(1, 1), padding="VALID",
            dimension_numbers=("NCHW", "OIHW", "NCHW"),
            feature_group_count=C)

    d = conv(x) - conv(t)
    return jnp.mean(jnp.sqrt(d * d + CHARBONNIER_EPS ** 2))


if __name__ == "__main__":
    key = jax.random.PRNGKey(0)
    kx, kt, kw = jax.random.split(key, 3)

    B, C, H, W = 2, 4, 16, 16
    OC, K = 64, 3

    x = jax.random.normal(kx, (B, C, H, W), jnp.float32)
    t = jax.random.normal(kt, (B, C, H, W), jnp.float32)
    weight = make_lbp_weight(kw, C, OC, K, sparcity=0.9)

    out = lbp_loss(x, t, weight, ksize=K)
    out = jax.block_until_ready(out)

    ref = lbp_loss_ref(x, t, weight, ksize=K)
    assert jnp.allclose(out, ref, rtol=2e-4, atol=1e-6), (out, ref)
    print("KERNEL_OK")
</pallas_src>

<mosaic_0001>
module attributes {stable_mosaic.version = 11 : i64} {
  func.func @_lbp_loss_kernel(%arg0: i32, %arg1: memref<1x16x16x4xf32, #tpu.memory_space<vmem>>, %arg2: memref<1x16x16x4xf32, #tpu.memory_space<vmem>>, %arg3: memref<36x64xf32, #tpu.memory_space<vmem>>, %arg4: memref<1x1x64xf32, #tpu.memory_space<vmem>>) attributes {dimension_semantics = [#tpu.dimension_semantics<parallel>], iteration_bounds = array<i64: 2>, scalar_prefetch = 0 : i64, scratch_operands = 0 : i64, tpu.core_type = #tpu.core_type<tc>, window_params = [{transform_indices = @transform_0, window_bounds = array<i64: 1, 16, 16, 4>}, {transform_indices = @transform_1, window_bounds = array<i64: 1, 16, 16, 4>}, {pipeline_mode = #tpu.pipeline_mode<synchronous>, transform_indices = @transform_2, window_bounds = array<i64: 36, 64>}, {transform_indices = @transform_3, window_bounds = array<i64: 1, 1, 64>}]} {
    %c0 = arith.constant 0 : index
    %c0_0 = arith.constant 0 : index
    %0 = vector.load %arg3[%c0, %c0_0] : memref<36x64xf32, #tpu.memory_space<vmem>>, vector<36x64xf32>
    %cst = arith.constant 0.000000e+00 : f32
    %1 = vector.broadcast %cst : f32 to vector<1x64xf32>
    %cst_1 = arith.constant 9.99999997E-7 : f32
    %c0_i32 = arith.constant 0 : i32
    %c14_i32 = arith.constant 14 : i32
    %2 = arith.addi %c0_i32, %c14_i32 : i32
    %c1_i32 = arith.constant 1 : i32
    %3 = scf.for %arg5 = %c0_i32 to %2 step %c1_i32 iter_args(%arg6 = %1) -> (vector<1x64xf32>)  : i32 {
      %c0_6 = arith.constant 0 : index
      %6 = arith.index_cast %arg5 : i32 to index
      %c0_7 = arith.constant 0 : index
      %c0_8 = arith.constant 0 : index
      %7 = vector.load %arg1[%c0_6, %6, %c0_7, %c0_8] : memref<1x16x16x4xf32, #tpu.memory_space<vmem>>, vector<1x3x16x4xf32>
      %8 = vector.shape_cast %7 : vector<1x3x16x4xf32> to vector<3x16x4xf32>
      %c0_9 = arith.constant 0 : index
      %9 = arith.index_cast %arg5 : i32 to index
      %c0_10 = arith.constant 0 : index
      %c0_11 = arith.constant 0 : index
      %10 = vector.load %arg2[%c0_9, %9, %c0_10, %c0_11] : memref<1x16x16x4xf32, #tpu.memory_space<vmem>>, vector<1x3x16x4xf32>
      %11 = vector.shape_cast %10 : vector<1x3x16x4xf32> to vector<3x16x4xf32>
      %12 = arith.subf %8, %11 : vector<3x16x4xf32>
      %13 = vector.extract_strided_slice %12 {offsets = [0, 0, 0], sizes = [1, 14, 4], strides = [1, 1, 1]} : vector<3x16x4xf32> to vector<1x14x4xf32>
      %14 = vector.shape_cast %13 : vector<1x14x4xf32> to vector<14x4xf32>
      %15 = vector.extract_strided_slice %12 {offsets = [0, 1, 0], sizes = [1, 14, 4], strides = [1, 1, 1]} : vector<3x16x4xf32> to vector<1x14x4xf32>
      %16 = vector.shape_cast %15 : vector<1x14x4xf32> to vector<14x4xf32>
      %17 = vector.extract_strided_slice %12 {offsets = [0, 2, 0], sizes = [1, 14, 4], strides = [1, 1, 1]} : vector<3x16x4xf32> to vector<1x14x4xf32>
      %18 = vector.shape_cast %17 : vector<1x14x4xf32> to vector<14x4xf32>
      %19 = vector.extract_strided_slice %12 {offsets = [1, 0, 0], sizes = [1, 14, 4], strides = [1, 1, 1]} : vector<3x16x4xf32> to vector<1x14x4xf32>
      %20 = vector.shape_cast %19 : vector<1x14x4xf32> to vector<14x4xf32>
      %21 = vector.extract_strided_slice %12 {offsets = [1, 1, 0], sizes = [1, 14, 4], strides = [1, 1, 1]} : vector<3x16x4xf32> to vector<1x14x4xf32>
      %22 = vector.shape_cast %21 : vector<1x14x4xf32> to vector<14x4xf32>
      %23 = vector.extract_strided_slice %12 {offsets = [1, 2, 0], sizes = [1, 14, 4], strides = [1, 1, 1]} : vector<3x16x4xf32> to vector<1x14x4xf32>
      %24 = vector.shape_cast %23 : vector<1x14x4xf32> to vector<14x4xf32>
      %25 = vector.extract_strided_slice %12 {offsets = [2, 0, 0], sizes = [1, 14, 4], strides = [1, 1, 1]} : vector<3x16x4xf32> to vector<1x14x4xf32>
      %26 = vector.shape_cast %25 : vector<1x14x4xf32> to vector<14x4xf32>
      %27 = vector.extract_strided_slice %12 {offsets = [2, 1, 0], sizes = [1, 14, 4], strides = [1, 1, 1]} : vector<3x16x4xf32> to vector<1x14x4xf32>
      %28 = vector.shape_cast %27 : vector<1x14x4xf32> to vector<14x4xf32>
      %29 = vector.extract_strided_slice %12 {offsets = [2, 2, 0], sizes = [1, 14, 4], strides = [1, 1, 1]} : vector<3x16x4xf32> to vector<1x14x4xf32>
      %30 = vector.shape_cast %29 : vector<1x14x4xf32> to vector<14x4xf32>
      %31 = tpu.concatenate %14, %16, %18, %20, %22, %24, %26, %28, %30 in 1 : vector<14x4xf32>, vector<14x4xf32>, vector<14x4xf32>, vector<14x4xf32>, vector<14x4xf32>, vector<14x4xf32>, vector<14x4xf32>, vector<14x4xf32>, vector<14x4xf32> -> vector<14x36xf32>
      %cst_12 = arith.constant dense<0.000000e+00> : vector<14x64xf32>
      %32 = tpu.matmul %31, %0, %cst_12 {dimension_numbers = #tpu.dot_dimension_numbers<[1], [0], [0], [1], [0, 0, 1, 1], [], []>} : vector<14x36xf32>, vector<36x64xf32>, vector<14x64xf32> -> vector<14x64xf32>
      %33 = arith.mulf %32, %32 : vector<14x64xf32>
      %34 = vector.broadcast %cst_1 : f32 to vector<14x64xf32>
      %35 = arith.addf %33, %34 : vector<14x64xf32>
      %36 = math.sqrt %35 : vector<14x64xf32>
      %cst_13 = arith.constant dense<0.000000e+00> : vector<64xf32>
      %37 = vector.multi_reduction <add>, %36, %cst_13 [0] : vector<14x64xf32> to vector<64xf32>
      %38 = vector.shape_cast %37 : vector<64xf32> to vector<1x64xf32>
      %39 = arith.addf %arg6, %38 : vector<1x64xf32>
      scf.yield %39 : vector<1x64xf32>
    }
    %c14_i32_2 = arith.constant 14 : i32
    %4 = vector.shape_cast %3 : vector<1x64xf32> to vector<1x1x64xf32>
    %c0_3 = arith.constant 0 : index
    %c0_4 = arith.constant 0 : index
    %c0_5 = arith.constant 0 : index
    %5 = vector.load %arg4[%c0_3, %c0_4, %c0_5] : memref<1x1x64xf32, #tpu.memory_space<vmem>>, vector<1x1x64xf32>
    tpu.vector_store %arg4[%c0_3, %c0_4, %c0_5], %4 {strides = array<i32>} : memref<1x1x64xf32, #tpu.memory_space<vmem>>, vector<1x1x64xf32>,
    return
  }
  func.func @transform_0(%arg0: i32) -> (i32, i32, i32, i32) {
    %c0_i32 = arith.constant 0 : i32
    %c0_i32_0 = arith.constant 0 : i32
    %c0_i32_1 = arith.constant 0 : i32
    %c0_i32_2 = arith.constant 0 : i32
    return %arg0, %c0_i32, %c0_i32_0, %c0_i32_1 : i32, i32, i32, i32
  }
  func.func @transform_1(%arg0: i32) -> (i32, i32, i32, i32) {
    %c0_i32 = arith.constant 0 : i32
    %c0_i32_0 = arith.constant 0 : i32
    %c0_i32_1 = arith.constant 0 : i32
    %c0_i32_2 = arith.constant 0 : i32
    return %arg0, %c0_i32, %c0_i32_0, %c0_i32_1 : i32, i32, i32, i32
  }
  func.func @transform_2(%arg0: i32) -> (i32, i32) {
    %c0_i32 = arith.constant 0 : i32
    %c0_i32_0 = arith.constant 0 : i32
    %c0_i32_1 = arith.constant 0 : i32
    return %c0_i32, %c0_i32_0 : i32, i32
  }
  func.func @transform_3(%arg0: i32) -> (i32, i32, i32) {
    %c0_i32 = arith.constant 0 : i32
    %c0_i32_0 = arith.constant 0 : i32
    %c0_i32_1 = arith.constant 0 : i32
    return %arg0, %c0_i32, %c0_i32_0 : i32, i32, i32
  }
}

</mosaic_0001>

<bundles_post_ra>
// kernel: tpu_custom_call.1
= control target key start
LH: loop header
LB: loop body
LE: loop exit
PB: predicated region body
PF: predicated region fallthrough
CT: control target
= control target key end

     0   :  { %8 = vsyncpa [#allocation3], 0  ;;  %s941_s0 = inlined_call_operand.vmem [shape: f32[2,16,16,4], index: 0, kind: input, shape index: {}]   ;;  %s942_s1 = inlined_call_operand.vmem [shape: f32[2,16,16,4], index: 1, kind: input, shape index: {}]   ;;  %s943_s2 = inlined_call_operand.vmem [shape: f32[36,64], index: 2, kind: input, shape index: {}]   ;;  %s944_s3 = inlined_call_operand.hbm [shape: f32[2,1,64], index: 3, kind: output, shape index: {}]  }
   0x1   :  { %10 = vsyncpa [#allocation3 + $0x1], 0  ;;  %s750_s12 = smov 0   ;;  %s752_s13 = smov 0  }
   0x2   :  { %s754_s14 = smov 0   ;;  %s756_s15 = smov 0  }
   0x3 LB: > { %s771_s16 = sadd.s32 4294967295, %s711_s15   ;;  %s529_s17 = sadd.s32 4294967294, %s711_s15   ;;  %s711_s15 = sphi %s756_s15, %s951_s15   ;;  %s707_s14 = sphi %s754_s14, %s950_s14   ;;  %s703_s13 = sphi %s752_s13, %s949_s13   ;;  %s699_s12 = sphi %s750_s12, %s948_s12  }
   0x4   : > { %s775_s18 = sadd.s32 1, %s711_s15   ;;  %s96_s19 = sadd.s32 1, %s707_s14 }
   0x5   : > { %s93_s20 = ssub.s32 %s711_s15, %s775_s18  ;;  %p106_p0 = scmp.ne.s32.totalorder %s707_s14, %s703_s13 }
   0x6   : > { %p94_p1 = scmp.eq.s32.totalorder %s93_s20, 0  ;;  %p107_p2 = scmp.eq.s32.totalorder %s771_s16, 1 }
   0x7   : > { %p112_p3 = scmp.ne.s32.totalorder %s703_s13, %s699_s12  ;;  %p113_p4 = scmp.eq.s32.totalorder %s529_s17, 1 }
   0x8   : > { %s786_s21 = scalar_select %p94_p1, %s707_s14, %s96_s19  }
   0x9   : > { %p788_p5 = por %p107_p2, %p106_p0  ;;  %p792_p6 = por %p113_p4, %p112_p3 }
   0xa   : > { %p532_p7 = scmp.ge.s32.totalorder %s711_s15, 1  ;;  %p150_p8 = scmp.lt.s32.totalorder %s711_s15, 3 }
   0xc   : > { %p151_p9 = pnand %p532_p7, %p150_p8 }
   0xd   : > { %s176_s24 = sand.u32 (!%p151_p9), 1, %s703_s13   ;;  %p178_p10 = scmp.lt.s32.totalorder (!%p151_p9), %s771_s16, 1  ;;  %v803_v0 = vld [vmem:[%s943_s2] sm:$0xff] (!%p151_p9)  ;;  %v808_v1 = vld [vmem:[%s943_s2 + $0x8] sm:$0xff] (!%p151_p9)  ;;  %v813_v2 = vld [vmem:[%s943_s2 + $0x10] sm:$0xff] (!%p151_p9)  ;;  %v840_v5 = vmov (!%p151_p9), 0.0  }
   0xe   : > { %154 = sbr.rel (%p151_p9) target bundleno = 439 (0x1b7), region = 32  ;;  %v818_v3 = vld [vmem:[%s943_s2 + $0x18] sm:$0xff] (!%p151_p9)  ;;  %v823_v4 = vld [vmem:[%s943_s2 + $0x20] sm:$0xf] (!%p151_p9)  ;;  %s838_s26 = scalar_lea.vmem (!%p151_p9), [#allocation2], %s176_s24 }
   0xf   : > { %s842_s27 = smov (!%p151_p9), 0  }
  0x15   : > { %s179_s8 = scalar_select %p178_p10, %s771_s16, 1 }
  0x17   : > { %s544_s9 = sshll.u32 %s179_s8, 8 }
  0x18   : > { %s829_s17 = scalar_lea.vmem %s941_s0, %s544_s9  ;;  %s834_s25 = scalar_lea.vmem %s942_s1, %s544_s9 }
  0x19 LB: >> { %s537_s28 = sshll.u32 %s719_s27, 4  ;;  %s721_s4 = smov 12   ;;  %vm233_vm0 = vcmask 1045504   ;;  %vm223_vm1 = vcmask 1046528   ;;  %v566_v26 = vpack.c.bf16 %v808_v1, %v803_v0  ;;  %v570_v31 = vpack.c.bf16 %v818_v3, %v813_v2  ;;  %s719_s27 = sphi %s842_s27, %s198_s27   ;;  %v715_v5 = vphi %v840_v5, %v947_v5  }
  0x1a   : >> { %s852_s29 = scalar_lea.vmem %s829_s17, %s537_s28  ;;  %s855_s30 = scalar_lea.vmem %s834_s25, %s537_s28  ;;  %vm326_vm2 = vcmask 1043456   ;;  %vm295_vm3 = vcmask 31744   ;;  %vm298_vm4 = vcmask 64512   ;;  %vm301_vm5 = vcmask 97280  }
  0x1b   : >> { %v205_v6 = vld [vmem:[%s852_s29 + $0x18] sm:$0xff]  ;;  %v204_v8 = vld [vmem:[%s852_s29 + $0x10] sm:$0xff]  ;;  %v203_v11 = vld [vmem:[%s852_s29 + $0x8] sm:$0xff]  ;;  %s722_s5 = smov 8   ;;  %s723_s6 = smov 4   ;;  %567 = vmatprep.subr.bf16.mxu0 %v566_v26  ;;  %vm304_vm6 = vcmask 130048  }
  0x1c   : >> { %v212_v7 = vld [vmem:[%s855_s30 + $0x18] sm:$0xff]  ;;  %v211_v10 = vld [vmem:[%s855_s30 + $0x10] sm:$0xff]  ;;  %v210_v12 = vld [vmem:[%s855_s30 + $0x8] sm:$0xff]  ;;  %569 = vmatpush3.bf16.msra.mxu0 %v566_v26  ;;  %s724_s7 = smov 16   ;;  %s725_s8 = smov 20   ;;  %vm307_vm7 = vcmask 162816  }
  0x1d   : >> { %v218_v9 = vsub.f32 %v205_v6, %v212_v7  ;;  %v217_v13 = vsub.f32 %v204_v8, %v211_v10  ;;  %v863_v14 = vsub.f32 %v203_v11, %v210_v12  ;;  %v202_v15 = vld [vmem:[%s852_s29] sm:$0xff]  ;;  %v207_v30 = vld [vmem:[%s852_s29 + $0x28] sm:$0xff]  ;;  %571 = vmatprep.subr.bf16.mxu0 %v570_v31  ;;  %s726_s9 = smov 24   ;;  %s727_s10 = smov 28   ;;  %vm310_vm8 = vcmask 195584  }
  0x1e   : >> { %v209_v16 = vld [vmem:[%s855_s30] sm:$0xff]  ;;  %v214_v32 = vld [vmem:[%s855_s30 + $0x28] sm:$0xff]  ;;  %s728_s11 = smov 32   ;;  %vm313_vm9 = vcmask 228352   ;;  %vm316_vm10 = vcmask 261120   ;;  %vm319_vm11 = vcmask 293888  }
  0x1f   : >> { %247 = vrot.lane.b32.xlu1 %v218_v9, %s721_s4  ;;  %v867_v17 = vsub.f32 %v202_v15, %v209_v16  ;;  %245 = vrot.lane.b32.xlu0 %v217_v13, %s721_s4  ;;  %v235_v18 = vrot.slane %v863_v14, 2  ;;  %v225_v19 = vrot.slane %v863_v14, 1  ;;  %v252_v24 = vrot.slane %v218_v9, 1  ;;  %v206_v33 = vld [vmem:[%s852_s29 + $0x20] sm:$0xff]  ;;  %s198_s27 = sadd.s32 1, %s719_s27  }
  0x20   : >> { %v251_v25 = vrot.slane %v217_v13, 1  ;;  %v261_v28 = vrot.slane %v218_v9, 2  ;;  %v260_v29 = vrot.slane %v217_v13, 2  ;;  %v213_v34 = vld [vmem:[%s855_s30 + $0x20] sm:$0xff]  ;;  %573 = vmatpush3.bf16.msra.mxu0 %v570_v31  ;;  %v220_v36 = vsub.f32 %v207_v30, %v214_v32  ;;  %p195_p11 = scmp.ge.s32.totalorder %s198_s27, 14  }
  0x21   : >> { %v234_v20 = vrot.slane %v867_v17, 2  ;;  %v224_v21 = vrot.slane %v867_v17, 1  ;;  %v219_v37 = vsub.f32 %v206_v33, %v213_v34  ;;  %561 = vmatprep.subr.msk.mxu0 %vm326_vm2, %v823_v4  ;;  %vm425_vm12 = vcmask 521216   ;;  %s541_s19 = sshll.u32 (%p195_p11), %s771_s16, 4  ;;  %s450_s30 = sshll.u32 (%p195_p11), %s838_s26, 4  ;;  %s451_s30 = int_to_ptr.vmem [resolvable:$true] %s450_s30 }
  0x22   : >> { %v253_v27 = vsel %vm223_vm1, %v251_v25, %v252_v24  ;;  %v262_v35 = vsel %vm233_vm0, %v260_v29, %v261_v28  ;;  %v278_v38 = vrot.slane %v220_v36, 1  ;;  %v287_v41 = vrot.slane %v220_v36, 2  ;;  %s902_s29 = scalar_lea.hbm (%p195_p11), %s944_s3, %s541_s19  ;;  %s438_s4 = scalar_lea.sflag (%p195_p11), [#allocation3], %s176_s24 }
  0x23   : >> { %239 = vrot.lane.b32.xlu1 %v235_v18, %s722_s5  ;;  %229 = vrot.lane.b32.xlu0 %v225_v19, %s723_s6  ;;  %v236_v22 = vsel %vm233_vm0, %v234_v20, %v235_v18  ;;  %v226_v23 = vsel %vm223_vm1, %v224_v21, %v225_v19  ;;  %v277_v39 = vrot.slane %v219_v37, 1  ;;  %v286_v42 = vrot.slane %v219_v37, 2  ;;  %s729_s17 = smov (%p195_p11), [#allocation2]  }
  0x24   : >> { %562 = vmatpush3.msk.msra.mxu0 %vm326_vm2, %v823_v4  ;;  %vm423_vm14 = vcmask 523264   ;;  %vm435_vm2 = vcmask (%p195_p11), 516096   ;;  %s645_s25 = sshll.u32 (%p195_p11), %s729_s17, 4  ;;  %s646_s25 = int_to_ptr.vmem [resolvable:$false] %s645_s25 }
  0x25   : >> { %v279_v40 = vsel %vm223_vm1, %v277_v39, %v278_v38  ;;  %v288_v43 = vsel %vm233_vm0, %v286_v42, %v287_v41  ;;  %s647_s27 = scalar_lea.vmem (%p195_p11), %s646_s25, 32  ;;  %p648_p1 = scmp.lt.s32.totalorder (%p195_p11), %s451_s30, %s646_s25 }
  0x27   : >> { %237 = vrot.lane.b32.xlu1 %v236_v22, %s722_s5  ;;  %227 = vrot.lane.b32.xlu0 %v226_v23, %s723_s6  ;;  %s641_s5 = scalar_lea.vmem (%p195_p11), %s451_s30, 16 }
  0x28   : > { %p642_p12 = scmp.ne.s32.totalorder (%p195_p11), %s451_s30, %s641_s5  ;;  %p649_p2 = scmp.lt.s32.totalorder (%p195_p11), %s647_s27, %s641_s5 }
  0x2a   : > { %p643_p13 = pnand (%p195_p11), %p642_p12, %p788_p5  ;;  %p650_p3 = por (%p195_p11), %p649_p2, %p648_p1 }
  0x2b   : >> { %256 = vrot.lane.b32.xlu1 %v252_v24, %s724_s7  ;;  %254 = vrot.lane.b32.xlu0 %v253_v27, %s724_s7 }
  0x2c   : > { %p644_p0 = pneg (%p195_p11), %p643_p13 }
  0x2e   : > { %p651_p4 = pnand (%p195_p11), %p650_p3, %p644_p0 }
  0x2f   : >> { %265 = vrot.lane.b32.xlu1 %v261_v28, %s725_s8  ;;  %263 = vrot.lane.b32.xlu0 %v262_v35, %s725_s8 }
  0x33   : >> { %273 = vrot.lane.b32.xlu1 %v220_v36, %s726_s9  ;;  %271 = vrot.lane.b32.xlu0 %v219_v37, %s726_s9 }
  0x37   : >> { %282 = vrot.lane.b32.xlu1 %v278_v38, %s727_s10  ;;  %280 = vrot.lane.b32.xlu0 %v279_v40, %s727_s10 }
  0x3b   : >> { %291 = vrot.lane.b32.xlu1 %v287_v41, %s728_s11  ;;  %289 = vrot.lane.b32.xlu0 %v288_v43, %s728_s11 }
  0x91   : >> { %v248_v44 = vpop.permute.xlu1 %247  ;;  %v246_v45 = vpop.permute.xlu0 %245 }
  0x95   : >> { %v240_v46 = vpop.permute.xlu1 %239  ;;  %v230_v47 = vpop.permute.xlu0 %229 }
  0x96   : >> { %v297_v55 = vsel %vm295_vm3, %v863_v14, %v230_v47 }
  0x97   : >> { %v300_v58 = vsel %vm298_vm4, %v297_v55, %v240_v46 }
  0x98   : >> { %v303_v61 = vsel %vm301_vm5, %v300_v58, %v248_v44 }
  0x99   : >> { %v238_v48 = vpop.permute.xlu1 %237  ;;  %v228_v49 = vpop.permute.xlu0 %227 }
  0x9a   : >> { %v296_v53 = vsel %vm295_vm3, %v867_v17, %v228_v49 }
  0x9b   : >> { %v299_v56 = vsel %vm298_vm4, %v296_v53, %v238_v48 }
  0x9c   : >> { %v302_v60 = vsel %vm301_vm5, %v299_v56, %v246_v45 }
  0x9d   : >> { %v257_v50 = vpop.permute.xlu1 %256  ;;  %v255_v51 = vpop.permute.xlu0 %254 }
  0x9e   : >> { %v306_v63 = vsel %vm304_vm6, %v303_v61, %v257_v50  ;;  %v305_v7 = vsel %vm304_vm6, %v302_v60, %v255_v51 }
  0xa1   : >> { %v266_v52 = vpop.permute.xlu1 %265  ;;  %v264_v54 = vpop.permute.xlu0 %263 }
  0xa2   : >> { %v309_v8 = vsel %vm307_vm7, %v306_v63, %v266_v52  ;;  %v308_v9 = vsel %vm307_vm7, %v305_v7, %v264_v54 }
  0xa5   : >> { %v274_v57 = vpop.permute.xlu1 %273  ;;  %v272_v59 = vpop.permute.xlu0 %271 }
  0xa6   : >> { %v312_v10 = vsel %vm310_vm8, %v309_v8, %v274_v57  ;;  %v311_v11 = vsel %vm310_vm8, %v308_v9, %v272_v59 }
  0xa9   : >> { %v283_v62 = vpop.permute.xlu1 %282  ;;  %v281_v6 = vpop.permute.xlu0 %280 }
  0xaa   : >> { %v315_v12 = vsel %vm313_vm9, %v312_v10, %v283_v62  ;;  %v314_v14 = vsel %vm313_vm9, %v311_v11, %v281_v6 }
  0xad   : >> { %v292_v13 = vpop.permute.xlu1 %291  ;;  %v290_v16 = vpop.permute.xlu0 %289 }
  0xae   : >> { %v318_v15 = vsel %vm316_vm10, %v315_v12, %v292_v13  ;;  %v317_v17 = vsel %vm316_vm10, %v314_v14, %v290_v16 }
  0xaf   : >> { %563 = vmatprep.mubr.msk.f32.mxu0 %vm319_vm11, %v317_v17 }
  0xb0   : >> { %564 = vmatmul.mubr.msk.f32.vlgmr.msra.gmra.mrb[0].mxu0 %vm319_vm11, %v318_v15 }
 0x183   : >> { %v565_v18 = vpop.f32.mrb[0].mxu0 }
 0x184   : >> { %v406_v19 = vmul.f32 %v565_v18, %v565_v18  ;;  %v396_v20 = vpop.f32.mrb[1].mxu0 }
 0x185   : >> { %v405_v21 = vmul.f32 %v396_v20, %v396_v20 }
 0x186   : >> { %v408_v22 = vadd.f32 1e-06, %v406_v19 }
 0x187   : >> { %v407_v23 = vadd.f32 1e-06, %v405_v21 }
 0x188   : >> { %637 = vrsqrt.f32 %v408_v22  ;;  %vm418_vm13 = vcmp.eq.f32.partialorder %v408_v22, inf  ;;  %v421_v27 = vand.u32 2147483648, %v408_v22  ;;  %vm420_vm15 = vcmp.eq.f32.partialorder %v408_v22, 0.0 }
 0x189   : >> { %639 = vrsqrt.f32 %v407_v23  ;;  %vm411_vm0 = vcmp.eq.f32.partialorder %v407_v23, inf  ;;  %v414_v30 = vand.u32 2147483648, %v407_v23  ;;  %vm413_vm1 = vcmp.eq.f32.partialorder %v407_v23, 0.0 }
 0x192   : >> { %v638_v24 = vpop.eup %637 }
 0x193   : >> { %v640_v25 = vpop.eup %639  ;;  %v417_v26 = vmul.f32 %v638_v24, %v408_v22 }
 0x194   : >> { %v410_v28 = vmul.f32 %v640_v25, %v407_v23 }
 0x195   : >> { %v419_v29 = vsel %vm418_vm13, %v408_v22, %v417_v26 }
 0x196   : >> { %v422_v31 = vsel %vm420_vm15, %v421_v27, %v419_v29  ;;  %v412_v32 = vsel %vm411_vm0, %v407_v23, %v410_v28 }
 0x197   : >> { %v426_v33 = vsel %vm425_vm12, %v422_v31, 0.0  ;;  %v415_v34 = vsel %vm413_vm1, %v414_v30, %v412_v32 }
 0x198   : >> { %v424_v35 = vsel %vm423_vm14, %v415_v34, 0.0 }
 0x199   : >> { %v427_v36 = vadd.f32 %v426_v33, %v424_v35 }
 0x19b   : >> { %v428_v37 = vrot.slane %v427_v36, 4 }
 0x19d   : >> { %v429_v38 = vadd.f32 %v428_v37, %v427_v36 }
 0x19f   : >> { %v430_v39 = vrot.slane %v429_v38, 2 }
 0x1a1   : >> { %v431_v40 = vadd.f32 %v430_v39, %v429_v38 }
 0x1a3   : >> { %v432_v41 = vrot.slane %v431_v40, 1  ;;  %197 = sbr.rel (!%p195_p11) target bundleno = 25 (0x19), region = 79 }
 0x1a5   : >> { %v433_v42 = vadd.f32 %v432_v41, %v431_v40 }
 0x1a7   : >> { %v434_v43 = vadd.f32 %v715_v5, %v433_v42  }
 0x1a9   : >> { %v947_v5 = vmov %v434_v43  ;;  %436 = vst.msk [vmem:[%s838_s26] sm:$0x1] (%p195_p11), %vm435_vm2, %v434_v43 }
 0x1aa   : > { %654 = shalt.err (!%p651_p4)
}
 0x1ab   : > { %s655_s16 = scalar_lea.hbm %s902_s29, 16  ;;  %s659_s6 = scalar_lea.hbm %s944_s3, 32 }
 0x1ac   : > { %p656_p7 = scmp.ne.s32.totalorder %s902_s29, %s655_s16  ;;  %p660_p10 = scmp.lt.u32.totalorder %s902_s29, %s944_s3 }
 0x1ad   : > { %p661_p11 = scmp.lt.u32.totalorder %s659_s6, %s655_s16  ;;  %p663_p13 = scmp.lt.u32.totalorder %s655_s16, %s902_s29 }
 0x1ae   : > { %p657_p8 = pnand %p656_p7, %p788_p5 }
 0x1af   : > { %p662_p12 = por %p661_p11, %p660_p10 }
 0x1b0   : > { %p658_p9 = pneg %p657_p8 }
 0x1b1   : > { %p664_p0 = por %p663_p13, %p662_p12 }
 0x1b3   : > { %p665_p1 = pnand %p664_p0, %p658_p9 }
 0x1b5   : > { %668 = shalt.err (!%p665_p1)
}
 0x1b6   : > { %574 = dma.vmem_to_hbm [thread:$0]  (%p788_p5), %s451_s30, 16, %s902_s29, %s438_s4  }
 0x1b7 PF: > { %p580_p2 = scmp.ge.s32.totalorder %s711_s15, 2  ;;  %s462_s9 = sand.u32 1, %s699_s12  }
 0x1b8   : > { %s463_s10 = scalar_lea.sflag [#allocation3], %s462_s9 }
 0x1b9   : > { %p577_p3 = pnand %p580_p2, %p792_p6 }
 0x1bb   : > { %694 = dma.done.wait (!%p577_p3), %s463_s10, 16  }
 0x1bc   : > { %696 = vsyncadd (!%p577_p3), %s463_s10, 4294967280  ;;  %p13_p4 = scmp.ge.s32.totalorder %s775_s18, 4   ;;  %s948_s12 = smov %s703_s13 }
 0x1bd   : > { %s949_s13 = smov %s707_s14  ;;  %s950_s14 = smov %s786_s21 }
 0x1be   : > { %s951_s15 = smov %s775_s18  ;;  %15 = sbr.rel (!%p13_p4) target bundleno = 3 (0x3), region = 90 }
 0x1c5   :  { %467 = vsyncpa [#allocation3], 1 }
 0x1c6   :  { %469 = vsyncpa [#allocation3 + $0x1], 1 }

</bundles_post_ra>
